<compile_context>
chip_gen: v7x
topology: tpu7x:2x2x1
jax: 0.10.0
libtpu: 0.0.40
codegen_flags: <defaults>
</compile_context>

<pallas_src>
import functools

import jax
import jax.numpy as jnp
from jax import lax
from jax.experimental import pallas as pl
from jax.experimental.pallas import tpu as pltpu

VMEM_LIMIT = 64 * 1024 * 1024  # sized for v7x's 64 MiB; fine on v5e/v6e too


def _tile(dim, pref):
    """Largest power-of-two-ish tile <= pref that divides dim (fallback: full dim)."""
    if dim <= pref:
        return dim
    t = pref
    while dim % t != 0:
        t //= 2
        if t < 8:
            return dim
    return t


# ----------------------------- Pallas kernels ------------------------------

def _matmul_kernel(x_ref, w_ref, o_ref, acc_ref):
    # grid: (M/tm, N/tn, K/tk); x f32, w bf16 (pre-transposed (K, N)); f32 accumulate.
    @pl.when(pl.program_id(2) == 0)
    def _():
        acc_ref[...] = jnp.zeros_like(acc_ref)

    acc_ref[...] += jnp.dot(x_ref[...].astype(jnp.bfloat16), w_ref[...],
                            preferred_element_type=jnp.float32)

    @pl.when(pl.program_id(2) == pl.num_programs(2) - 1)
    def _():
        o_ref[...] = acc_ref[...]


def _qk_norm_kernel(q_ref, k_ref, gq_ref, gk_ref, qo_ref, ko_ref, *, eps):
    # q_norm / k_norm over the full hidden dim (f32 elementwise math).
    def rms(x, g):
        var = jnp.mean(x * x, axis=-1, keepdims=True)
        return x * lax.rsqrt(var + eps) * g

    qo_ref[...] = rms(q_ref[...], gq_ref[...])
    ko_ref[...] = rms(k_ref[...], gk_ref[...])


def _flash_attn_kernel(qn_ref, kn_ref, v_ref, cosq_ref, sinq_ref, cosk_ref,
                       sink_ref, o_ref, m_sc, l_sc, acc_sc, *, scale, tq, tk):
    # grid: (num_heads, T/tq, T/tk); KV axis last ("arbitrary").
    qi = pl.program_id(1)
    ki = pl.program_id(2)

    @pl.when(ki == 0)
    def _():
        m_sc[...] = jnp.full_like(m_sc, -1e30)
        l_sc[...] = jnp.zeros_like(l_sc)
        acc_sc[...] = jnp.zeros_like(acc_sc)

    # skip KV blocks strictly above the causal diagonal
    @pl.when(ki * tk <= qi * tq + (tq - 1))
    def _():
        def rope(x, cos, sin):
            # rotate-half via XLU roll; sign of the rotation folded into `sin`
            hd = x.shape[-1]
            return x * cos + pltpu.roll(x, shift=hd // 2, axis=1) * sin

        q = rope(qn_ref[...], cosq_ref[...], sinq_ref[...]) * scale   # (tq, hd) f32
        k = rope(kn_ref[...], cosk_ref[...], sink_ref[...])           # (tk, hd) f32

        s = lax.dot_general(q.astype(jnp.bfloat16), k.astype(jnp.bfloat16),
                            dimension_numbers=(((1,), (1,)), ((), ())),
                            preferred_element_type=jnp.float32)       # (tq, tk)

        row = qi * tq + lax.broadcasted_iota(jnp.int32, (tq, tk), 0)
        col = ki * tk + lax.broadcasted_iota(jnp.int32, (tq, tk), 1)
        s = jnp.where(col <= row, s, -1e30)                           # f32 mask

        m_new = jnp.maximum(m_sc[...], jnp.max(s, axis=-1, keepdims=True))
        alpha = jnp.exp(m_sc[...] - m_new)
        p = jnp.exp(s - m_new)
        l_sc[...] = alpha * l_sc[...] + jnp.sum(p, axis=-1, keepdims=True)
        acc_sc[...] = alpha * acc_sc[...] + jnp.dot(
            p.astype(jnp.bfloat16), v_ref[...].astype(jnp.bfloat16),
            preferred_element_type=jnp.float32)
        m_sc[...] = m_new

    @pl.when(ki == pl.num_programs(2) - 1)
    def _():
        o_ref[...] = acc_sc[...] * pl.reciprocal(l_sc[...], approx=True)


def _linear_norm_add_kernel(x_ref, w_ref, g_ref, r_ref, o_ref, acc_ref, *, eps):
    # o_proj (K tiled) fused with RMSNorm + residual add epilogue.
    k = pl.program_id(1)

    @pl.when(k == 0)
    def _():
        acc_ref[...] = jnp.zeros_like(acc_ref)

    acc_ref[...] += jnp.dot(x_ref[...].astype(jnp.bfloat16), w_ref[...],
                            preferred_element_type=jnp.float32)

    @pl.when(k == pl.num_programs(1) - 1)
    def _():
        y = acc_ref[...]
        var = jnp.mean(y * y, axis=-1, keepdims=True)
        o_ref[...] = y * lax.rsqrt(var + eps) * g_ref[...] + r_ref[...]


def _mlp_norm_add_kernel(x_ref, wg_ref, wu_ref, wd_ref, g_ref, r_ref, o_ref,
                         acc_ref, *, eps):
    # SwiGLU MLP tiled over the intermediate dim, fused with RMSNorm + residual add.
    j = pl.program_id(1)

    @pl.when(j == 0)
    def _():
        acc_ref[...] = jnp.zeros_like(acc_ref)

    xb = x_ref[...].astype(jnp.bfloat16)                                   # (tm, H)
    gate = jnp.dot(xb, wg_ref[...], preferred_element_type=jnp.float32)    # (tm, ti)
    up = jnp.dot(xb, wu_ref[...], preferred_element_type=jnp.float32)      # (tm, ti)
    act = (gate * jax.nn.sigmoid(gate) * up).astype(jnp.bfloat16)          # f32 math
    acc_ref[...] += jnp.dot(act, wd_ref[...],
                            preferred_element_type=jnp.float32)            # (tm, H)

    @pl.when(j == pl.num_programs(1) - 1)
    def _():
        y = acc_ref[...]
        var = jnp.mean(y * y, axis=-1, keepdims=True)
        o_ref[...] = y * lax.rsqrt(var + eps) * g_ref[...] + r_ref[...]


def _rmsnorm_kernel(x_ref, g_ref, o_ref, *, eps):
    x = x_ref[...]
    var = jnp.mean(x * x, axis=-1, keepdims=True)
    o_ref[...] = x * lax.rsqrt(var + eps) * g_ref[...]


# ------------------------------ wrappers ------------------------------------

def pallas_matmul(x, w_t):
    """x (T, K) f32, w_t (K, N) bf16 (pre-transposed) -> (T, N) f32."""
    T, K = x.shape
    _, N = w_t.shape
    tm, tn, tk = _tile(T, 256), _tile(N, 256), _tile(K, 512)
    return pl.pallas_call(
        _matmul_kernel,
        out_shape=jax.ShapeDtypeStruct((T, N), jnp.float32),
        grid_spec=pltpu.PrefetchScalarGridSpec(
            num_scalar_prefetch=0,
            grid=(T // tm, N // tn, K // tk),
            in_specs=[pl.BlockSpec((tm, tk), lambda i, j, k: (i, k)),
                      pl.BlockSpec((tk, tn), lambda i, j, k: (k, j))],
            out_specs=pl.BlockSpec((tm, tn), lambda i, j, k: (i, j)),
            scratch_shapes=[pltpu.VMEM((tm, tn), jnp.float32)]),
        compiler_params=pltpu.CompilerParams(
            dimension_semantics=("parallel", "parallel", "arbitrary"),
            vmem_limit_bytes=VMEM_LIMIT),
    )(x, w_t)


def pallas_qk_norm(qkv, gq, gk, eps, H):
    """Slice q/k column-blocks straight out of qkv (T, 3H) and RMS-normalize them."""
    T = qkv.shape[0]
    tm = _tile(T, 256)
    spec_q = pl.BlockSpec((tm, H), lambda i: (i, 0))
    spec_k = pl.BlockSpec((tm, H), lambda i: (i, 1))
    g_spec = pl.BlockSpec((1, H), lambda i: (0, 0))
    out_spec = pl.BlockSpec((tm, H), lambda i: (i, 0))
    return pl.pallas_call(
        functools.partial(_qk_norm_kernel, eps=eps),
        out_shape=(jax.ShapeDtypeStruct((T, H), jnp.float32),
                   jax.ShapeDtypeStruct((T, H), jnp.float32)),
        grid_spec=pltpu.PrefetchScalarGridSpec(
            num_scalar_prefetch=0,
            grid=(T // tm,),
            in_specs=[spec_q, spec_k, g_spec, g_spec],
            out_specs=[out_spec, out_spec]),
        compiler_params=pltpu.CompilerParams(
            dimension_semantics=("parallel",),
            vmem_limit_bytes=VMEM_LIMIT),
    )(qkv, qkv, gq, gk)


def pallas_flash_attention(qn, kn, qkv, cos, sin, nh, hd, scale):
    """Flash causal attention. qn/kn (T, H); v read directly from qkv (T, 3H).
    Output (T, H) in the same token-major layout (no transposes)."""
    T, H = qn.shape
    tq = _tile(T, 128)
    tk = tq
    head_q = pl.BlockSpec((tq, hd), lambda h, qi, ki: (qi, h))
    head_k = pl.BlockSpec((tk, hd), lambda h, qi, ki: (ki, h))
    head_v = pl.BlockSpec((tk, hd), lambda h, qi, ki: (ki, 2 * nh + h))
    rope_q = pl.BlockSpec((tq, hd), lambda h, qi, ki: (qi, 0))
    rope_k = pl.BlockSpec((tk, hd), lambda h, qi, ki: (ki, 0))
    return pl.pallas_call(
        functools.partial(_flash_attn_kernel, scale=scale, tq=tq, tk=tk),
        out_shape=jax.ShapeDtypeStruct((T, H), jnp.float32),
        grid_spec=pltpu.PrefetchScalarGridSpec(
            num_scalar_prefetch=0,
            grid=(nh, T // tq, T // tk),
            in_specs=[head_q, head_k, head_v, rope_q, rope_q, rope_k, rope_k],
            out_specs=pl.BlockSpec((tq, hd), lambda h, qi, ki: (qi, h)),
            scratch_shapes=[pltpu.VMEM((tq, 1), jnp.float32),
                            pltpu.VMEM((tq, 1), jnp.float32),
                            pltpu.VMEM((tq, hd), jnp.float32)]),
        compiler_params=pltpu.CompilerParams(
            dimension_semantics=("parallel", "parallel", "arbitrary"),
            vmem_limit_bytes=VMEM_LIMIT),
    )(qn, kn, qkv, cos, sin, cos, sin)


def pallas_linear_norm_add(x, w_t, gamma, residual, eps):
    """out = rmsnorm(x @ w_t) * gamma + residual. w_t (K, N) bf16."""
    T, K = x.shape
    _, N = w_t.shape
    tm, tk = _tile(T, 256), _tile(K, 512)
    return pl.pallas_call(
        functools.partial(_linear_norm_add_kernel, eps=eps),
        out_shape=jax.ShapeDtypeStruct((T, N), jnp.float32),
        grid_spec=pltpu.PrefetchScalarGridSpec(
            num_scalar_prefetch=0,
            grid=(T // tm, K // tk),
            in_specs=[pl.BlockSpec((tm, tk), lambda i, k: (i, k)),
                      pl.BlockSpec((tk, N), lambda i, k: (k, 0)),
                      pl.BlockSpec((1, N), lambda i, k: (0, 0)),
                      pl.BlockSpec((tm, N), lambda i, k: (i, 0))],
            out_specs=pl.BlockSpec((tm, N), lambda i, k: (i, 0)),
            scratch_shapes=[pltpu.VMEM((tm, N), jnp.float32)]),
        compiler_params=pltpu.CompilerParams(
            dimension_semantics=("parallel", "arbitrary"),
            vmem_limit_bytes=VMEM_LIMIT),
    )(x, w_t, gamma, residual)


def pallas_mlp_norm_add(x, wg_t, wu_t, wd_t, gamma, residual, eps):
    """out = rmsnorm(down(silu(x@wg_t) * (x@wu_t))) * gamma + residual.
    Intermediate dim tiled; (T, I) never materialized."""
    T, H = x.shape
    I = wg_t.shape[1]
    tm, ti = _tile(T, 256), _tile(I, 512)
    return pl.pallas_call(
        functools.partial(_mlp_norm_add_kernel, eps=eps),
        out_shape=jax.ShapeDtypeStruct((T, H), jnp.float32),
        grid_spec=pltpu.PrefetchScalarGridSpec(
            num_scalar_prefetch=0,
            grid=(T // tm, I // ti),
            in_specs=[pl.BlockSpec((tm, H), lambda i, j: (i, 0)),
                      pl.BlockSpec((H, ti), lambda i, j: (0, j)),
                      pl.BlockSpec((H, ti), lambda i, j: (0, j)),
                      pl.BlockSpec((ti, H), lambda i, j: (j, 0)),
                      pl.BlockSpec((1, H), lambda i, j: (0, 0)),
                      pl.BlockSpec((tm, H), lambda i, j: (i, 0))],
            out_specs=pl.BlockSpec((tm, H), lambda i, j: (i, 0)),
            scratch_shapes=[pltpu.VMEM((tm, H), jnp.float32)]),
        compiler_params=pltpu.CompilerParams(
            dimension_semantics=("parallel", "arbitrary"),
            vmem_limit_bytes=VMEM_LIMIT),
    )(x, wg_t, wu_t, wd_t, gamma, residual)


def pallas_rmsnorm(x, gamma, eps):
    T, H = x.shape
    tm = _tile(T, 256)
    return pl.pallas_call(
        functools.partial(_rmsnorm_kernel, eps=eps),
        out_shape=jax.ShapeDtypeStruct((T, H), jnp.float32),
        grid_spec=pltpu.PrefetchScalarGridSpec(
            num_scalar_prefetch=0,
            grid=(T // tm,),
            in_specs=[pl.BlockSpec((tm, H), lambda i: (i, 0)),
                      pl.BlockSpec((1, H), lambda i: (0, 0))],
            out_specs=pl.BlockSpec((tm, H), lambda i: (i, 0))),
        compiler_params=pltpu.CompilerParams(
            dimension_semantics=("parallel",),
            vmem_limit_bytes=VMEM_LIMIT),
    )(x, gamma)


# ------------------------------ model glue -----------------------------------

def rope_cos_sin(positions, head_dim, theta):
    # neox-style cache; rotate-half sign folded into sin so the kernel can use
    # a pure lane-roll:  out = x*cos + roll(x, hd/2)*sin_signed.
    inv_freq = 1.0 / (theta ** (jnp.arange(0, head_dim, 2, dtype=jnp.float32)
                                / head_dim))
    freqs = positions.astype(jnp.float32)[:, None] * inv_freq[None, :]  # (T, hd/2)
    cos = jnp.concatenate([jnp.cos(freqs), jnp.cos(freqs)], axis=-1)
    sin = jnp.concatenate([-jnp.sin(freqs), jnp.sin(freqs)], axis=-1)
    return cos, sin


def olmo_model_forward(input_ids, positions, params, cfg):
    H = cfg["hidden_size"]
    nh = cfg["num_attention_heads"]
    hd = H // nh
    eps = cfg["rms_norm_eps"]
    scale = hd ** -0.5

    # VocabParallelEmbedding lookup (glue: plain JAX gather)
    h = params["embed"][input_ids].astype(jnp.float32)            # (T, H)

    cos, sin = rope_cos_sin(positions, hd, cfg["rope_theta"])

    for layer in params["layers"]:
        # ---- self attention (qkv -> q/k norm -> rope+flash-attn -> o_proj+norm+add) ----
        residual = h
        qkv = pallas_matmul(h, layer["w_qkv_t"])                   # (T, 3H)
        qn, kn = pallas_qk_norm(qkv, layer["q_norm"], layer["k_norm"], eps, H)
        attn_out = pallas_flash_attention(qn, kn, qkv, cos, sin, nh, hd, scale)
        h = pallas_linear_norm_add(attn_out, layer["w_o_t"],
                                   layer["input_ln"], residual, eps)

        # ---- MLP (gate/up/silu*mul/down + post_attention_layernorm + residual) ----
        residual = h
        h = pallas_mlp_norm_add(h, layer["w_gate_t"], layer["w_up_t"],
                                layer["w_down_t"], layer["post_ln"],
                                residual, eps)

    return pallas_rmsnorm(h, params["norm"], eps)


def init_params(key, cfg):
    """Weights stored pre-transposed (in, out) and pre-cast to bf16 ONCE here."""
    H = cfg["hidden_size"]
    I = cfg["intermediate_size"]
    V = cfg["vocab_size"]
    L = cfg["num_hidden_layers"]

    keys = jax.random.split(key, 1 + L)
    params = {
        "embed": jax.random.normal(keys[0], (V, H), jnp.float32) * 0.02,
        "norm": jnp.ones((1, H), jnp.float32),
        "layers": [],
    }
    for l in range(L):
        kq, ko, kg, ku, kd, kn1, kn2 = jax.random.split(keys[1 + l], 7)
        layer = {
            "w_qkv_t": (jax.random.normal(kq, (H, 3 * H), jnp.float32)
                        * 0.02).astype(jnp.bfloat16),
            "w_o_t": (jax.random.normal(ko, (H, H), jnp.float32)
                      * 0.02).astype(jnp.bfloat16),
            "q_norm": 1.0 + 0.01 * jax.random.normal(kn1, (1, H), jnp.float32),
            "k_norm": 1.0 + 0.01 * jax.random.normal(kn2, (1, H), jnp.float32),
            "input_ln": jnp.ones((1, H), jnp.float32),
            "post_ln": jnp.ones((1, H), jnp.float32),
            "w_gate_t": (jax.random.normal(kg, (H, I), jnp.float32)
                         * 0.02).astype(jnp.bfloat16),
            "w_up_t": (jax.random.normal(ku, (H, I), jnp.float32)
                       * 0.02).astype(jnp.bfloat16),
            "w_down_t": (jax.random.normal(kd, (I, H), jnp.float32)
                         * 0.02).astype(jnp.bfloat16),
        }
        params["layers"].append(layer)
    return params


if __name__ == "__main__":
    # Small but lane-dense config (head_dim=128 as in real Olmo2).
    cfg = dict(
        vocab_size=128,
        hidden_size=256,
        num_attention_heads=2,     # head_dim = 128, num_kv_heads == num_heads
        intermediate_size=512,
        num_hidden_layers=2,
        rms_norm_eps=1e-6,
        rope_theta=500000.0,
    )
    T = 16  # number of tokens (single flat sequence, vLLM-style)

    key = jax.random.PRNGKey(0)
    k_ids, k_params = jax.random.split(key)
    input_ids = jax.random.randint(k_ids, (T,), 0, cfg["vocab_size"],
                                   dtype=jnp.int32)
    positions = jnp.arange(T, dtype=jnp.int32)
    params = init_params(k_params, cfg)

    out = olmo_model_forward(input_ids, positions, params, cfg)
    out = jax.block_until_ready(out)
    assert out.shape == (T, cfg["hidden_size"])
    assert bool(jnp.all(jnp.isfinite(out)))
    print("KERNEL_OK")
</pallas_src>

<mosaic_0001>
module attributes {stable_mosaic.version = 11 : i64} {
  func.func @_matmul_kernel(%arg0: i32, %arg1: i32, %arg2: i32, %arg3: memref<16x256xf32, #tpu.memory_space<vmem>>, %arg4: memref<256x256xbf16, #tpu.memory_space<vmem>>, %arg5: memref<16x256xf32, #tpu.memory_space<vmem>>, %arg6: memref<16x256xf32, #tpu.memory_space<vmem>>) attributes {dimension_semantics = [#tpu.dimension_semantics<parallel>, #tpu.dimension_semantics<parallel>, #tpu.dimension_semantics<arbitrary>], iteration_bounds = array<i64: 1, 3, 1>, scalar_prefetch = 0 : i64, scratch_operands = 1 : i64, tpu.core_type = #tpu.core_type<tc>, window_params = [{transform_indices = @transform_0, window_bounds = array<i64: 16, 256>}, {transform_indices = @transform_1, window_bounds = array<i64: 256, 256>}, {transform_indices = @transform_2, window_bounds = array<i64: 16, 256>}]} {
    %c0_i32 = arith.constant 0 : i32
    %0 = arith.cmpi eq, %arg2, %c0_i32 : i32
    %1 = arith.extui %0 : i1 to i32
    %c0_i32_0 = arith.constant 0 : i32
    %2 = arith.cmpi ne, %1, %c0_i32_0 : i32
    scf.if %2 {
      %cst_10 = arith.constant 0.000000e+00 : f32
      %13 = vector.broadcast %cst_10 : f32 to vector<16x256xf32>
      %c0_11 = arith.constant 0 : index
      %c0_12 = arith.constant 0 : index
      %14 = vector.load %arg6[%c0_11, %c0_12] : memref<16x256xf32, #tpu.memory_space<vmem>>, vector<16x256xf32>
      tpu.vector_store %arg6[%c0_11, %c0_12], %13 {strides = array<i32>} : memref<16x256xf32, #tpu.memory_space<vmem>>, vector<16x256xf32>,
    } else {
    }
    %c0 = arith.constant 0 : index
    %c0_1 = arith.constant 0 : index
    %3 = vector.load %arg6[%c0, %c0_1] : memref<16x256xf32, #tpu.memory_space<vmem>>, vector<16x256xf32>
    %c0_2 = arith.constant 0 : index
    %c0_3 = arith.constant 0 : index
    %4 = vector.load %arg3[%c0_2, %c0_3] : memref<16x256xf32, #tpu.memory_space<vmem>>, vector<16x256xf32>
    %5 = arith.truncf %4 : vector<16x256xf32> to vector<16x256xbf16>
    %c0_4 = arith.constant 0 : index
    %c0_5 = arith.constant 0 : index
    %6 = vector.load %arg4[%c0_4, %c0_5] : memref<256x256xbf16, #tpu.memory_space<vmem>>, vector<256x256xbf16>
    %cst = arith.constant dense<0.000000e+00> : vector<16x256xf32>
    %7 = tpu.matmul %5, %6, %cst {dimension_numbers = #tpu.dot_dimension_numbers<[1], [0], [0], [1], [0, 0, 1, 1], [], []>} : vector<16x256xbf16>, vector<256x256xbf16>, vector<16x256xf32> -> vector<16x256xf32>
    %8 = arith.addf %3, %7 : vector<16x256xf32>
    %c0_6 = arith.constant 0 : index
    %c0_7 = arith.constant 0 : index
    %9 = vector.load %arg6[%c0_6, %c0_7] : memref<16x256xf32, #tpu.memory_space<vmem>>, vector<16x256xf32>
    tpu.vector_store %arg6[%c0_6, %c0_7], %8 {strides = array<i32>} : memref<16x256xf32, #tpu.memory_space<vmem>>, vector<16x256xf32>,
    %c0_i32_8 = arith.constant 0 : i32
    %10 = arith.cmpi eq, %arg2, %c0_i32_8 : i32
    %11 = arith.extui %10 : i1 to i32
    %c0_i32_9 = arith.constant 0 : i32
    %12 = arith.cmpi ne, %11, %c0_i32_9 : i32
    scf.if %12 {
      %c0_10 = arith.constant 0 : index
      %c0_11 = arith.constant 0 : index
      %13 = vector.load %arg6[%c0_10, %c0_11] : memref<16x256xf32, #tpu.memory_space<vmem>>, vector<16x256xf32>
      %c0_12 = arith.constant 0 : index
      %c0_13 = arith.constant 0 : index
      %14 = vector.load %arg5[%c0_12, %c0_13] : memref<16x256xf32, #tpu.memory_space<vmem>>, vector<16x256xf32>
      tpu.vector_store %arg5[%c0_12, %c0_13], %13 {strides = array<i32>} : memref<16x256xf32, #tpu.memory_space<vmem>>, vector<16x256xf32>,
    } else {
    }
    return
  }
  func.func @transform_0(%arg0: i32, %arg1: i32, %arg2: i32) -> (i32, i32) {
    %c0_i32 = arith.constant 0 : i32
    return %arg0, %arg2 : i32, i32
  }
  func.func @transform_1(%arg0: i32, %arg1: i32, %arg2: i32) -> (i32, i32) {
    %c0_i32 = arith.constant 0 : i32
    return %arg2, %arg1 : i32, i32
  }
  func.func @transform_2(%arg0: i32, %arg1: i32, %arg2: i32) -> (i32, i32) {
    %c0_i32 = arith.constant 0 : i32
    return %arg0, %arg1 : i32, i32
  }
}

</mosaic_0001>

<bundles_post_ra>
// kernel: tpu_custom_call.1
= control target key start
LH: loop header
LB: loop body
LE: loop exit
PB: predicated region body
PF: predicated region fallthrough
CT: control target
= control target key end

     0   :  { %7 = vsyncpa [#allocation4], 0  ;;  %s1216_s0 = inlined_call_operand.hbm [shape: f32[16,256], index: 0, kind: input, shape index: {}]   ;;  %s1217_s1 = inlined_call_operand.hbm [shape: bf16[256,768], index: 1, kind: input, shape index: {}]   ;;  %s1218_s2 = inlined_call_operand.hbm [shape: f32[16,768], index: 2, kind: output, shape index: {}]  }
   0x1   :  { %8 = vsyncpa [#allocation7], 0 }
   0x2   :  { %10 = vsyncpa [#allocation7 + $0x1], 0 }
   0x3   :  { %11 = vsyncpa [#allocation5], 0 }
   0x4   :  { %13 = vsyncpa [#allocation5 + $0x1], 0  ;;  %s970_s9 = smov 0   ;;  %s972_s10 = smov 0  }
   0x5   :  { %s974_s11 = smov 0   ;;  %s976_s12 = smov 0  }
   0x6   :  { %s978_s13 = smov 0   ;;  %s980_s14 = smov 0  }
   0x7 LB: > { %s618_s15 = sadd.s32 4294967295, %s942_s14   ;;  %s619_s16 = sadd.s32 4294967294, %s942_s14   ;;  %s942_s14 = sphi %s980_s14, %s19_s14   ;;  %s938_s13 = sphi %s978_s13, %s1243_s13   ;;  %s934_s12 = sphi %s976_s12, %s1242_s12   ;;  %s930_s11 = sphi %s974_s11, %s1241_s11   ;;  %s926_s10 = sphi %s972_s10, %s1240_s10   ;;  %s922_s9 = sphi %s970_s9, %s1239_s9  }
   0x8   : > { %p82_p0 = scmp.ne.s32.totalorder %s930_s11, %s926_s10  ;;  %p83_p1 = scmp.eq.s32.totalorder %s942_s14, 0 }
   0x9   : > { %p88_p2 = scmp.ne.s32.totalorder %s926_s10, %s922_s9  ;;  %p1007_p3 = scmp.eq.s32.totalorder %s618_s15, 0 }
   0xa   : > { %p1011_p4 = por %p83_p1, %p82_p0  ;;  %p114_p5 = scmp.eq.s32.totalorder %s618_s15, 2 }
   0xb   : > { %s1225_s17 = scalar_select %p1007_p3, 1, 0 }
   0xc   : > { %p1017_p6 = por %p1007_p3, %p88_p2  ;;  %p120_p7 = scmp.eq.s32.totalorder %s619_s16, 2 }
   0xd   : > { %p1021_p8 = por %p114_p5, %p82_p0  ;;  %p620_p9 = scmp.ge.s32.totalorder %s942_s14, 1 }
   0xe   : > { %s1227_s19 = scalar_select %p1017_p6, 1, 0 }
   0xf   : > { %s1228_s20 = scalar_select %p1021_p8, 1, 0 }
  0x10   : > { %p1026_p10 = por %p120_p7, %p88_p2  ;;  %p127_p11 = scmp.lt.s32.totalorder %s942_s14, 4 }
  0x11   : > { %s944_s23 = smov [#allocation3]   ;;  %p690_p0 = scmp.lt.s32.totalorder %s942_s14, 3 }
  0x12   : > { %s1229_s21 = scalar_select %p1026_p10, 1, 0 }
  0x13   : > { %p1031_p12 = pnand %p620_p9, %p127_p11  ;;  %s145_s24 = sshll.u32 %s944_s23, 4  ;;  %s146_s24 = int_to_ptr.vmem [resolvable:$true] %s145_s24 }
  0x14   : > { %p1046_p2 = pnand %p690_p0, %p1011_p4  ;;  %s34_s27 = sadd.s32 1, %s938_s13 }
  0x15   : > { %s1230_s22 = scalar_select %p1031_p12, 1, 0 }
  0x16   : > { %p677_p13 = pneg %p1031_p12  ;;  %s798_s30 = scalar_lea.hbm %s1216_s0, 512 }
  0x17   : > { %s1232_s26 = scalar_select %p1046_p2, 1, 0 }
  0x18   : > { %p1040_p1 = pnand %p677_p13, %p1007_p3  ;;  %p799_p5 = scmp.ne.s32.totalorder %s1216_s0, %s798_s30 }
  0x19   : > { %p805_p4 = scmp.lt.u32.totalorder %s798_s30, %s1216_s0 }
  0x1a   : > { %p800_p7 = pneg %p1040_p1 }
  0x1c   : > { %p801_p9 = pnand %p800_p7, %p799_p5 }
  0x1e   : > { %p802_p11 = pneg %p801_p9 }
  0x20   : > { %p807_p13 = pnand %p805_p4, %p802_p11 }
  0x22   : > { %810 = shalt.err (!%p807_p13)
}
  0x23   : > { %s811_s7 = scalar_lea.vmem %s146_s24, 512  ;;  %p819_p6 = scmp.lt.s32.totalorder %s146_s24, %s146_s24 }
  0x24   : > { %p812_p0 = scmp.ne.s32.totalorder %s146_s24, %s811_s7  ;;  %p820_p3 = scmp.lt.s32.totalorder %s811_s7, %s811_s7 }
  0x26   : > { %p814_p10 = pnand %p812_p0, %p800_p7  ;;  %p821_p12 = por %p820_p3, %p819_p6 }
  0x28   : > { %p815_p8 = pneg %p814_p10 }
  0x2a   : > { %p822_p2 = pnand %p821_p12, %p815_p8 }
  0x2c   : > { %825 = shalt.err (!%p822_p2)
}
  0x2d   : > { %s945_s8 = smov 256   ;;  %s946_s15 = smov 16  }
  0x2e   : > { %680 = dma.hbm_to_vmem [thread:$0]  (!%p1040_p1), %s1216_s0, 512, %s146_s24, [#allocation4], %s945_s8, %s945_s8, %s946_s15  }
  0x2f   : > { %p36_p5 = scmp.ge.s32.totalorder %s34_s27, 3  ;;  %s75_s23 = sadd.s32 1, %s930_s11 }
  0x30   : > { %s159_s28 = sand.u32 1, %s930_s11   ;;  %s667_s3 = sshll.u32 %s938_s13, 7 }
  0x31   : > { %s1245_s27 = smov (%p36_p5, %s34_s27), 0  ;;  %s623_s29 = sshll.u32 %s159_s28, 8 }
  0x32   : > { %s71_s30 = ssub.s32 %s938_s13, %s1245_s27  ;;  %s1077_s25 = scalar_lea.hbm %s1217_s1, %s667_s3 }
  0x33   : > { %p73_p3 = scmp.eq.s32.totalorder %s71_s30, 0  ;;  %s163_s24 = scalar_lea.vmem [#allocation6], %s623_s29 }
  0x34   : > { %s173_s6 = sshll.u32 %s163_s24, 4  ;;  %s1084_s8 = scalar_lea.sflag [#allocation7], %s159_s28  ;;  %s1082_s6 = int_to_ptr.vmem [resolvable:$true] %s173_s6 }
  0x35   : > { %s1080_s7 = scalar_select %p73_p3, %s930_s11, %s75_s23  }
  0x36   : > { %s826_s15 = scalar_lea.hbm %s1077_s25, 4096  ;;  %p1233_p8 = scmp.ne.s32.totalorder %s1232_s26, 0 }
  0x37   : > { %p827_p6 = scmp.ne.s32.totalorder %s1077_s25, %s826_s15  ;;  %s831_s30 = scalar_lea.hbm %s1217_s1, 12288 }
  0x38   : > { %p828_p10 = pneg %p1233_p8  ;;  %p832_p2 = scmp.lt.u32.totalorder %s1077_s25, %s1217_s1 }
  0x39   : > { %p833_p7 = scmp.lt.u32.totalorder %s831_s30, %s826_s15  ;;  %p835_p11 = scmp.lt.u32.totalorder %s826_s15, %s1077_s25 }
  0x3a   : > { %p829_p12 = pnand %p828_p10, %p827_p6 }
  0x3b   : > { %p834_p9 = por %p833_p7, %p832_p2 }
  0x3c   : > { %p830_p1 = pneg %p829_p12 }
  0x3d   : > { %p836_p4 = por %p835_p11, %p834_p9 }
  0x3f   : > { %p837_p13 = pnand %p836_p4, %p830_p1 }
  0x41   : > { %840 = shalt.err (!%p837_p13)
}
  0x42   : > { %s841_s23 = scalar_lea.vmem %s1082_s6, 4096  ;;  %s947_s28 = smov [#allocation6]  }
  0x43   : > { %p842_p0 = scmp.ne.s32.totalorder %s1082_s6, %s841_s23  ;;  %s846_s4 = sshll.u32 %s947_s28, 4  ;;  %s847_s4 = int_to_ptr.vmem [resolvable:$false] %s846_s4 }
  0x44   : > { %s848_s5 = scalar_lea.vmem %s847_s4, 8192  ;;  %p849_p6 = scmp.lt.s32.totalorder %s1082_s6, %s847_s4 }
  0x45   : > { %p844_p5 = pnand %p842_p0, %p828_p10  ;;  %p850_p12 = scmp.lt.s32.totalorder %s848_s5, %s841_s23 }
  0x47   : > { %p845_p3 = pneg %p844_p5  ;;  %p851_p2 = por %p850_p12, %p849_p6 }
  0x49   : > { %p852_p7 = pnand %p851_p2, %p845_p3 }
  0x4b   : > { %855 = shalt.err (!%p852_p7)
}
  0x4c   : > { %s948_s24 = smov 384   ;;  %s949_s15 = smov 128  }
  0x4d   : > { %s950_s16 = smov 8   ;;  %p1234_p10 = scmp.ne.s32.totalorder %s1230_s22, 0 }
  0x4e   : > { %684 = dma.hbm_to_vmem [thread:$0]  (!%p1233_p8), %s1077_s25, 4096, %s1082_s6, %s1084_s8, %s948_s24, %s949_s15, %s950_s16  }
  0x4f   : > { %185 = sbr.rel (%p1234_p10) target bundleno = 387 (0x183), region = 28  ;;  %p1235_p1 = scmp.ne.s32.totalorder (!%p1234_p10), %s1225_s17, 0 }
  0x56   : > { %909 = dma.done.wait (%p1235_p1), [#allocation4], 512  }
  0x57   : > { %911 = vsyncadd (%p1235_p1), [#allocation4], 4294966784  ;;  %s1119_s18 = sand.u32 1, %s926_s10   ;;  %p1236_p8 = scmp.ne.s32.totalorder %s1227_s19, 0 }
  0x58   : > { %s628_s30 = sshll.u32 %s1119_s18, 8  ;;  %s192_s29 = scalar_lea.sflag [#allocation7], %s1119_s18 }
  0x59   : > { %s1123_s3 = scalar_lea.vmem [#allocation6], %s628_s30 }
  0x5a   : > { %913 = dma.done.wait (%p1236_p8), %s192_s29, 4096  }
  0x5b   : > { %915 = vsyncadd (%p1236_p8), %s192_s29, 4294963200  ;;  %v750_v0 = vld [vmem:[%s1123_s3 + $0x4] ss:$8 sps:$4 sm:$0xff]   ;;  %v752_v1 = vld [vmem:[%s1123_s3] ss:$8 sps:$4 sm:$0xff]   ;;  %s629_s17 = sshll.u32 %s1119_s18, 5 }
  0x5c   : > { %432 = vmatprep.subr.bf16.mxu0 %v750_v0  ;;  %v753_v2 = vld [vmem:[%s1123_s3 + $0x14] ss:$8 sps:$4 sm:$0xff]   ;;  %v755_v3 = vld [vmem:[%s1123_s3 + $0x10] ss:$8 sps:$4 sm:$0xff]   ;;  %v756_v4 = vld [vmem:[%s1123_s3 + $0x24] ss:$8 sps:$4 sm:$0xff]  }
  0x5d   : > { %433 = vmatpush1.bf16.msra.mxu0 %v752_v1  ;;  %v758_v5 = vld [vmem:[%s1123_s3 + $0x20] ss:$8 sps:$4 sm:$0xff]   ;;  %v759_v6 = vld [vmem:[%s1123_s3 + $0x34] ss:$8 sps:$4 sm:$0xff]   ;;  %v761_v7 = vld [vmem:[%s1123_s3 + $0x30] ss:$8 sps:$4 sm:$0xff]  }
  0x5e   : > { %434 = vmatprep.subr.bf16.mxu0 %v753_v2  ;;  %v762_v8 = vld [vmem:[%s1123_s3 + $0x44] ss:$8 sps:$4 sm:$0xff]   ;;  %v764_v9 = vld [vmem:[%s1123_s3 + $0x40] ss:$8 sps:$4 sm:$0xff]   ;;  %v765_v10 = vld [vmem:[%s1123_s3 + $0x54] ss:$8 sps:$4 sm:$0xff]  }
  0x5f   : > { %v767_v11 = vld [vmem:[%s1123_s3 + $0x50] ss:$8 sps:$4 sm:$0xff]   ;;  %v768_v12 = vld [vmem:[%s1123_s3 + $0x64] ss:$8 sps:$4 sm:$0xff]   ;;  %v770_v16 = vld [vmem:[%s1123_s3 + $0x60] ss:$8 sps:$4 sm:$0xff]  }
  0x60   : > { %v235_v13 = vld [vmem:[#allocation3 + $0x8] sm:$0xff]  ;;  %v237_v14 = vld [vmem:[#allocation3 + $0x18] sm:$0xff]  ;;  %v234_v35 = vld [vmem:[#allocation3] sm:$0xff]  ;;  %s215_s19 = scalar_lea.vmem [#allocation8], %s629_s17  ;;  %s668_s26 = sshll.u32 %s934_s12, 8 }
  0x61   : > { %435 = vmatpush1.bf16.msra.mxu0 %v755_v3  ;;  %v239_v15 = vpack.c.bf16 %v237_v14, %v235_v13  ;;  %v771_v17 = vld [vmem:[%s1123_s3 + $0x74] ss:$8 sps:$4 sm:$0xff]   ;;  %v773_v18 = vld [vmem:[%s1123_s3 + $0x70] ss:$8 sps:$4 sm:$0xff]   ;;  %v774_v19 = vld [vmem:[%s1123_s3 + $0x84] ss:$8 sps:$4 sm:$0xff]   ;;  %s1168_s8 = scalar_lea.hbm %s1218_s2, %s668_s26 }
  0x62   : > { %436 = vmatprep.subr.bf16.mxu0 %v756_v4  ;;  %v776_v20 = vld [vmem:[%s1123_s3 + $0x80] ss:$8 sps:$4 sm:$0xff]   ;;  %v777_v21 = vld [vmem:[%s1123_s3 + $0x94] ss:$8 sps:$4 sm:$0xff]   ;;  %v779_v22 = vld [vmem:[%s1123_s3 + $0x90] ss:$8 sps:$4 sm:$0xff]  }
  0x63   : > { %464 = vmatprep.mubr.bf16.mxu0 %v239_v15  ;;  %v780_v23 = vld [vmem:[%s1123_s3 + $0xa4] ss:$8 sps:$4 sm:$0xff]   ;;  %v782_v24 = vld [vmem:[%s1123_s3 + $0xa0] ss:$8 sps:$4 sm:$0xff]   ;;  %v783_v25 = vld [vmem:[%s1123_s3 + $0xb4] ss:$8 sps:$4 sm:$0xff]  }
  0x64   : > { %v785_v26 = vld [vmem:[%s1123_s3 + $0xb0] ss:$8 sps:$4 sm:$0xff]   ;;  %v786_v27 = vld [vmem:[%s1123_s3 + $0xc4] ss:$8 sps:$4 sm:$0xff]   ;;  %v788_v28 = vld [vmem:[%s1123_s3 + $0xc0] ss:$8 sps:$4 sm:$0xff]  }
  0x65   : > { %437 = vmatpush1.bf16.msra.mxu0 %v758_v5  ;;  %v789_v29 = vld [vmem:[%s1123_s3 + $0xd4] ss:$8 sps:$4 sm:$0xff]   ;;  %v791_v30 = vld [vmem:[%s1123_s3 + $0xd0] ss:$8 sps:$4 sm:$0xff]   ;;  %v792_v31 = vld [vmem:[%s1123_s3 + $0xe4] ss:$8 sps:$4 sm:$0xff]  }
  0x66   : > { %438 = vmatprep.subr.bf16.mxu0 %v759_v6  ;;  %v794_v32 = vld [vmem:[%s1123_s3 + $0xe0] ss:$8 sps:$4 sm:$0xff]   ;;  %v795_v33 = vld [vmem:[%s1123_s3 + $0xf4] ss:$8 sps:$4 sm:$0xff]   ;;  %v797_v34 = vld [vmem:[%s1123_s3 + $0xf0] ss:$8 sps:$4 sm:$0xff]  }
  0x67   : > { %v236_v36 = vld [vmem:[#allocation3 + $0x10] sm:$0xff]  ;;  %s511_s22 = sshll.u32 %s215_s19, 4  ;;  %s495_s23 = scalar_lea.sflag [#allocation5], %s1119_s18  ;;  %s1163_s22 = int_to_ptr.vmem [resolvable:$true] %s511_s22 }
  0x68   : > { %v238_v37 = vpack.c.bf16 %v236_v36, %v234_v35  ;;  %s856_s12 = scalar_lea.vmem %s1163_s22, 512  ;;  %p1237_p11 = scmp.ne.s32.totalorder %s1228_s20, 0 }
  0x69   : > { %439 = vmatpush1.bf16.msra.mxu0 %v761_v7  ;;  %p857_p9 = scmp.ne.s32.totalorder %s1163_s22, %s856_s12  ;;  %s951_s28 = smov [#allocation8]  }
  0x6a   : > { %440 = vmatprep.subr.bf16.mxu0 %v762_v8  ;;  %s860_s4 = sshll.u32 %s951_s28, 4  ;;  %s861_s4 = int_to_ptr.vmem [resolvable:$false] %s860_s4 }
  0x6b   : > { %p858_p4 = pnand %p857_p9, %p1237_p11  ;;  %s862_s5 = scalar_lea.vmem %s861_s4, 1024 }
  0x6c   : > { %p863_p0 = scmp.lt.s32.totalorder %s1163_s22, %s861_s4  ;;  %p864_p5 = scmp.lt.s32.totalorder %s862_s5, %s856_s12 }
  0x6d   : > { %441 = vmatpush1.bf16.msra.mxu0 %v764_v9  ;;  %p859_p13 = pneg %p858_p4 }
  0x6e   : > { %442 = vmatprep.subr.bf16.mxu0 %v765_v10  ;;  %p865_p3 = por %p864_p5, %p863_p0 }
  0x70   : > { %p866_p6 = pnand %p865_p3, %p859_p13 }
  0x71   : > { %443 = vmatpush1.bf16.msra.mxu0 %v767_v11 }
  0x72   : > { %444 = vmatprep.subr.bf16.mxu0 %v768_v12 }
  0x75   : > { %445 = vmatpush1.bf16.msra.mxu0 %v770_v16 }
  0x76   : > { %446 = vmatprep.subr.bf16.mxu0 %v771_v17 }
  0x79   : > { %447 = vmatpush1.bf16.msra.mxu0 %v773_v18 }
  0x7a   : > { %448 = vmatprep.subr.bf16.mxu0 %v774_v19 }
  0x7d   : > { %449 = vmatpush1.bf16.msra.mxu0 %v776_v20 }
  0x7e   : > { %450 = vmatprep.subr.bf16.mxu0 %v777_v21 }
  0x81   : > { %451 = vmatpush1.bf16.msra.mxu0 %v779_v22 }
  0x82   : > { %452 = vmatprep.subr.bf16.mxu0 %v780_v23 }
  0x85   : > { %453 = vmatpush1.bf16.msra.mxu0 %v782_v24 }
  0x86   : > { %454 = vmatprep.subr.bf16.mxu0 %v783_v25 }
  0x89   : > { %455 = vmatpush1.bf16.msra.mxu0 %v785_v26 }
  0x8a   : > { %456 = vmatprep.subr.bf16.mxu0 %v786_v27 }
  0x8d   : > { %457 = vmatpush1.bf16.msra.mxu0 %v788_v28 }
  0x8e   : > { %458 = vmatprep.subr.bf16.mxu0 %v789_v29 }
  0x91   : > { %459 = vmatpush1.bf16.msra.mxu0 %v791_v30 }
  0x92   : > { %460 = vmatprep.subr.bf16.mxu0 %v792_v31 }
  0x95   : > { %461 = vmatpush1.bf16.msra.mxu0 %v794_v32 }
  0x96   : > { %462 = vmatprep.subr.bf16.mxu0 %v795_v33 }
  0x99   : > { %463 = vmatpush1.bf16.msra.mxu0 %v797_v34 }
  0x9c   : > { %465 = vmatmul.mubr.bf16.vlgmr.msra.gmra.mrb[0].mxu0 %v238_v37 }
 0x16f   : > { %v466_v38 = vpop.f32.mrb[0].mxu0 }
 0x170   : > { %490 = vst [vmem:[%s215_s19] sm:$0xff] %v466_v38  ;;  %v468_v39 = vpop.f32.mrb[1].mxu0 }
 0x171   : > { %491 = vst [vmem:[%s215_s19 + $0x8] sm:$0xff] %v468_v39  ;;  %v470_v40 = vpop.f32.mrb[2].mxu0 }
 0x172   : > { %492 = vst [vmem:[%s215_s19 + $0x10] sm:$0xff] %v470_v40  ;;  %v472_v41 = vpop.f32.mrb[3].mxu0 }
 0x173   : > { %493 = vst [vmem:[%s215_s19 + $0x18] sm:$0xff] %v472_v41 }
 0x174   : > { %869 = shalt.err (!%p866_p6)
}
 0x175   : > { %s870_s24 = scalar_lea.hbm %s1168_s8, 512  ;;  %s874_s30 = scalar_lea.hbm %s1218_s2, 1536 }
 0x176   : > { %p871_p12 = scmp.ne.s32.totalorder %s1168_s8, %s870_s24  ;;  %p875_p10 = scmp.lt.u32.totalorder %s1168_s8, %s1218_s2 }
 0x177   : > { %p876_p1 = scmp.lt.u32.totalorder %s874_s30, %s870_s24  ;;  %p878_p9 = scmp.lt.u32.totalorder %s870_s24, %s1168_s8 }
 0x178   : > { %p872_p2 = pnand %p871_p12, %p1237_p11 }
 0x179   : > { %p877_p8 = por %p876_p1, %p875_p10 }
 0x17a   : > { %p873_p7 = pneg %p872_p2 }
 0x17b   : > { %p879_p4 = por %p878_p9, %p877_p8 }
 0x17d   : > { %p880_p13 = pnand %p879_p4, %p873_p7 }
 0x17f   : > { %883 = shalt.err (!%p880_p13)
}
 0x180   : > { %s952_s17 = smov 256   ;;  %s953_s19 = smov 768  }
 0x181   : > { %s954_s26 = smov 16  }
 0x182   : > { %675 = dma.vmem_to_hbm [thread:$0]  (%p1237_p11), %s1163_s22, 512, %s1168_s8, %s495_s23, %s952_s17, %s953_s19, %s954_s26  }
 0x183 PF: > { %p692_p0 = scmp.ge.s32.totalorder %s942_s14, 2  ;;  %s526_s25 = sand.u32 1, %s922_s9  }
 0x184   : > { %p1238_p5 = scmp.ne.s32.totalorder %s1229_s21, 0  ;;  %s527_s6 = scalar_lea.sflag [#allocation5], %s526_s25 }
 0x186   : > { %p686_p3 = pnand %p692_p0, %p1238_p5 }
 0x188   : > { %917 = dma.done.wait (!%p686_p3), %s527_s6, 512  }
 0x189   : > { %919 = vsyncadd (!%p686_p3), %s527_s6, 4294966784  ;;  %s19_s14 = sadd.s32 1, %s942_s14   ;;  %s1239_s9 = smov %s926_s10 }
 0x18a   : > { %p16_p6 = scmp.ge.s32.totalorder %s19_s14, 5   ;;  %s1240_s10 = smov %s930_s11 }
 0x18b   : > { %s1241_s11 = smov %s1080_s7  ;;  %s1242_s12 = smov %s938_s13 }
 0x18c   : > { %s1243_s13 = smov %s1245_s27  ;;  %18 = sbr.rel (!%p16_p6) target bundleno = 7 (0x7), region = 87 }
 0x193   :  { %532 = vsyncpa [#allocation4], 1 }
 0x194   :  { %534 = vsyncpa [#allocation4 + $0x1], 1 }
 0x195   :  { %535 = vsyncpa [#allocation7], 1 }
 0x196   :  { %537 = vsyncpa [#allocation7 + $0x1], 1 }
 0x197   :  { %538 = vsyncpa [#allocation5], 1 }
 0x198   :  { %540 = vsyncpa [#allocation5 + $0x1], 1 }

</bundles_post_ra>
